<compile_context>
chip_gen: v5e
topology: v5e:2x2
jax: 0.10.0
libtpu: 0.0.40
codegen_flags: <defaults>
</compile_context>

<pallas_src>
import jax
import jax.numpy as jnp
from jax.experimental import pallas as pl
from jax.experimental.pallas import tpu as pltpu


def _round_up(n, m):
    return ((n + m - 1) // m) * m


def _cdiv(a, b):
    return -(-a // b)


def _mlp_kernel(x_ref, w1_ref, b1_ref, w2_ref, b2_ref, w3_ref, b3_ref, o_ref):
    # One batch tile per grid step; all three matmuls + ReLUs fused so the
    # intermediates never leave VMEM.  x / weights are bf16, accumulation and
    # bias / ReLU math are f32.
    x = x_ref[...]  # (tm, K) bf16
    h1 = jnp.dot(x, w1_ref[...], preferred_element_type=jnp.float32) + b1_ref[...]
    h1 = jnp.maximum(h1, 0.0)
    # TODO(synk): dropout(0.3) omitted (eval-mode identity); use pltpu.prng_* + 1/(1-p)
    # scaling for training-mode parity.
    h2 = (
        jnp.dot(h1.astype(jnp.bfloat16), w2_ref[...],
                preferred_element_type=jnp.float32)
        + b2_ref[...]
    )
    h2 = jnp.maximum(h2, 0.0)
    o_ref[...] = (
        jnp.dot(h2.astype(jnp.bfloat16), w3_ref[...],
                preferred_element_type=jnp.float32)
        + b3_ref[...]
    )


def pacman_net_forward(x, params, *, block_m=1024):
    """x: (B, H, W) float32. params: unpadded (w1,b1,w2,b2,w3,b3) with weights
    stored (in_features, out_features). Returns (B, output_size) float32."""
    w1, b1, w2, b2, w3, b3 = params
    B = x.shape[0]
    x_flat = x.reshape(B, -1).astype(jnp.float32)  # x.view(x.size(0), -1)
    in_feats = x_flat.shape[1]
    out_true = w3.shape[1]

    # --- feature-dim padding ---
    #   * K (x / w1 rows): pad to a 128-lane multiple so x loads are lane-dense.
    #   * hidden dims: only 8-sublane rounding (blocks equal full array dims,
    #     so no 128 padding is required, and it would triple the MACs).
    #   * output: pad only 4 -> 8 columns (narrow writeback instead of 128).
    K = _round_up(in_feats, 128)
    H1 = _round_up(w1.shape[1], 8)
    H2 = _round_up(w2.shape[1], 8)
    NO = max(_round_up(out_true, 8), 8)

    def pad2(a, rows, cols, dtype):
        a = jnp.pad(a, ((0, rows - a.shape[0]), (0, cols - a.shape[1])))
        return a.astype(dtype)

    # Weights in bf16 (MXU-native), biases stay f32.  Zero padding keeps the
    # padded lanes exactly 0 through ReLU, so slicing at the end is exact.
    w1p = pad2(w1, K, H1, jnp.bfloat16)
    b1p = pad2(b1, 1, H1, jnp.float32)
    w2p = pad2(w2, H1, H2, jnp.bfloat16)
    b2p = pad2(b2, 1, H2, jnp.float32)
    w3p = pad2(w3, H2, NO, jnp.bfloat16)
    b3p = pad2(b3, 1, NO, jnp.float32)

    # --- batch tiling ---
    # Large tiles amortize per-grid-step overhead; keep an even number of
    # tiles (>= 2) when the batch is large enough so v7x's two TensorCores
    # split the "parallel" axis evenly.  v5e/v6e just run the grid serially.
    if B <= block_m:
        n_tiles = 2 if B > 16 else 1
    else:
        n_tiles = _cdiv(B, block_m)
        if n_tiles % 2:
            n_tiles += 1
    tm = max(8, _round_up(_cdiv(B, n_tiles), 8))
    B_pad = n_tiles * tm

    x_p = jnp.pad(x_flat, ((0, B_pad - B), (0, K - in_feats))).astype(jnp.bfloat16)

    flops = 2 * B_pad * (K * H1 + H1 * H2 + H2 * NO)
    bytes_accessed = (
        2 * (B_pad * K + K * H1 + H1 * H2 + H2 * NO)  # bf16 x + weights
        + 4 * (B_pad * NO + H1 + H2 + NO)             # f32 output + biases
    )

    out = pl.pallas_call(
        _mlp_kernel,
        out_shape=jax.ShapeDtypeStruct((B_pad, NO), jnp.float32),
        grid_spec=pltpu.PrefetchScalarGridSpec(
            num_scalar_prefetch=0,
            grid=(n_tiles,),
            in_specs=[
                pl.BlockSpec((tm, K), lambda i: (i, 0)),   # x tile marches with grid
                pl.BlockSpec((K, H1), lambda i: (0, 0)),   # weights stay VMEM-resident
                pl.BlockSpec((1, H1), lambda i: (0, 0)),
                pl.BlockSpec((H1, H2), lambda i: (0, 0)),
                pl.BlockSpec((1, H2), lambda i: (0, 0)),
                pl.BlockSpec((H2, NO), lambda i: (0, 0)),
                pl.BlockSpec((1, NO), lambda i: (0, 0)),
            ],
            out_specs=pl.BlockSpec((tm, NO), lambda i: (i, 0)),
        ),
        compiler_params=pltpu.CompilerParams(
            dimension_semantics=("parallel",),  # megacore split on v7x
        ),
        cost_estimate=pl.CostEstimate(
            flops=flops, transcendentals=0, bytes_accessed=bytes_accessed
        ),
    )(x_p, w1p, b1p, w2p, b2p, w3p, b3p)

    # Slice away batch padding and the zero-padded logit columns.
    return out[:B, :out_true]


def init_params(key, input_size, hidden_size, output_size):
    """PyTorch-style Linear init: U(-1/sqrt(fan_in), 1/sqrt(fan_in)).

    Weights stored as (in_features, out_features); biases as (1, out)."""
    in_feats = input_size[0] * input_size[1]
    dims = [
        (in_feats, hidden_size * 2),
        (hidden_size * 2, hidden_size),
        (hidden_size, output_size),
    ]
    params = []
    for fan_in, fan_out in dims:
        key, kw, kb = jax.random.split(key, 3)
        bound = 1.0 / jnp.sqrt(jnp.float32(fan_in))
        w = jax.random.uniform(
            kw, (fan_in, fan_out), jnp.float32, minval=-bound, maxval=bound
        )
        b = jax.random.uniform(
            kb, (1, fan_out), jnp.float32, minval=-bound, maxval=bound
        )
        params += [w, b]
    return tuple(params)


def _reference_forward_f32(x, params):
    w1, b1, w2, b2, w3, b3 = params
    h = x.reshape(x.shape[0], -1)
    h = jnp.maximum(h @ w1 + b1, 0.0)
    h = jnp.maximum(h @ w2 + b2, 0.0)
    return h @ w3 + b3


def _reference_forward_bf16(x, params):
    # Mirrors the kernel's quantization: bf16 x/weights, f32 accumulation,
    # f32 bias/ReLU, bf16 re-cast of activations before the next matmul.
    w1, b1, w2, b2, w3, b3 = params
    bf = jnp.bfloat16
    h = x.reshape(x.shape[0], -1).astype(bf)
    h = jnp.maximum(
        jnp.dot(h, w1.astype(bf), preferred_element_type=jnp.float32) + b1, 0.0
    )
    h = jnp.maximum(
        jnp.dot(h.astype(bf), w2.astype(bf), preferred_element_type=jnp.float32) + b2,
        0.0,
    )
    return jnp.dot(h.astype(bf), w3.astype(bf), preferred_element_type=jnp.float32) + b3


if __name__ == "__main__":
    # Small shapes consistent with the module: 16x16 board, hidden=32, 4 moves.
    input_size = (16, 16)
    hidden_size = 32
    output_size = 4
    batch = 2

    key = jax.random.PRNGKey(0)
    key, kx = jax.random.split(key)
    x = jax.random.normal(kx, (batch, *input_size), jnp.float32)
    params = init_params(key, input_size, hidden_size, output_size)

    out = pacman_net_forward(x, params)
    out = jax.block_until_ready(out)

    assert out.shape == (batch, output_size)

    ref_bf16 = _reference_forward_bf16(x, params)
    ref_f32 = _reference_forward_f32(x, params)
    # Tight check against the precision-matched reference, loose check against
    # the full-f32 PyTorch-equivalent math (bf16 inputs/weights cost ~1e-3).
    assert jnp.allclose(out, ref_bf16, atol=2e-3, rtol=2e-3), "mismatch vs bf16 ref"
    assert jnp.allclose(out, ref_f32, atol=5e-2, rtol=5e-2), "mismatch vs f32 ref"

    print("KERNEL_OK")
</pallas_src>

<mosaic_0001>
module attributes {stable_mosaic.version = 11 : i64} {
  func.func @_mlp_kernel(%arg0: i32, %arg1: memref<8x256xbf16, #tpu.memory_space<vmem>>, %arg2: memref<256x64xbf16, #tpu.memory_space<vmem>>, %arg3: memref<1x64xf32, #tpu.memory_space<vmem>>, %arg4: memref<64x32xbf16, #tpu.memory_space<vmem>>, %arg5: memref<1x32xf32, #tpu.memory_space<vmem>>, %arg6: memref<32x8xbf16, #tpu.memory_space<vmem>>, %arg7: memref<1x8xf32, #tpu.memory_space<vmem>>, %arg8: memref<8x8xf32, #tpu.memory_space<vmem>>) attributes {dimension_semantics = [#tpu.dimension_semantics<parallel>], iteration_bounds = array<i64: 1>, scalar_prefetch = 0 : i64, scratch_operands = 0 : i64, tpu.core_type = #tpu.core_type<tc>, window_params = [{transform_indices = @transform_0, window_bounds = array<i64: 8, 256>}, {pipeline_mode = #tpu.pipeline_mode<synchronous>, transform_indices = @transform_1, window_bounds = array<i64: 256, 64>}, {pipeline_mode = #tpu.pipeline_mode<synchronous>, transform_indices = @transform_2, window_bounds = array<i64: 1, 64>}, {pipeline_mode = #tpu.pipeline_mode<synchronous>, transform_indices = @transform_3, window_bounds = array<i64: 64, 32>}, {pipeline_mode = #tpu.pipeline_mode<synchronous>, transform_indices = @transform_4, window_bounds = array<i64: 1, 32>}, {pipeline_mode = #tpu.pipeline_mode<synchronous>, transform_indices = @transform_5, window_bounds = array<i64: 32, 8>}, {pipeline_mode = #tpu.pipeline_mode<synchronous>, transform_indices = @transform_6, window_bounds = array<i64: 1, 8>}, {transform_indices = @transform_7, window_bounds = array<i64: 8, 8>}]} {
    %c0 = arith.constant 0 : index
    %c0_0 = arith.constant 0 : index
    %0 = vector.load %arg1[%c0, %c0_0] : memref<8x256xbf16, #tpu.memory_space<vmem>>, vector<8x256xbf16>
    %c0_1 = arith.constant 0 : index
    %c0_2 = arith.constant 0 : index
    %1 = vector.load %arg2[%c0_1, %c0_2] : memref<256x64xbf16, #tpu.memory_space<vmem>>, vector<256x64xbf16>
    %cst = arith.constant dense<0.000000e+00> : vector<8x64xf32>
    %2 = tpu.matmul %0, %1, %cst {dimension_numbers = #tpu.dot_dimension_numbers<[1], [0], [0], [1], [0, 0, 1, 1], [], []>} : vector<8x256xbf16>, vector<256x64xbf16>, vector<8x64xf32> -> vector<8x64xf32>
    %c0_3 = arith.constant 0 : index
    %c0_4 = arith.constant 0 : index
    %3 = vector.load %arg3[%c0_3, %c0_4] : memref<1x64xf32, #tpu.memory_space<vmem>>, vector<1x64xf32>
    %4 = vector.broadcast %3 : vector<1x64xf32> to vector<8x64xf32>
    %5 = arith.addf %2, %4 : vector<8x64xf32>
    %cst_5 = arith.constant 0.000000e+00 : f32
    %6 = vector.broadcast %cst_5 : f32 to vector<8x64xf32>
    %7 = arith.maximumf %5, %6 : vector<8x64xf32>
    %8 = arith.truncf %7 : vector<8x64xf32> to vector<8x64xbf16>
    %c0_6 = arith.constant 0 : index
    %c0_7 = arith.constant 0 : index
    %9 = vector.load %arg4[%c0_6, %c0_7] : memref<64x32xbf16, #tpu.memory_space<vmem>>, vector<64x32xbf16>
    %cst_8 = arith.constant dense<0.000000e+00> : vector<8x32xf32>
    %10 = tpu.matmul %8, %9, %cst_8 {dimension_numbers = #tpu.dot_dimension_numbers<[1], [0], [0], [1], [0, 0, 1, 1], [], []>} : vector<8x64xbf16>, vector<64x32xbf16>, vector<8x32xf32> -> vector<8x32xf32>
    %c0_9 = arith.constant 0 : index
    %c0_10 = arith.constant 0 : index
    %11 = vector.load %arg5[%c0_9, %c0_10] : memref<1x32xf32, #tpu.memory_space<vmem>>, vector<1x32xf32>
    %12 = vector.broadcast %11 : vector<1x32xf32> to vector<8x32xf32>
    %13 = arith.addf %10, %12 : vector<8x32xf32>
    %cst_11 = arith.constant 0.000000e+00 : f32
    %14 = vector.broadcast %cst_11 : f32 to vector<8x32xf32>
    %15 = arith.maximumf %13, %14 : vector<8x32xf32>
    %16 = arith.truncf %15 : vector<8x32xf32> to vector<8x32xbf16>
    %c0_12 = arith.constant 0 : index
    %c0_13 = arith.constant 0 : index
    %17 = vector.load %arg6[%c0_12, %c0_13] : memref<32x8xbf16, #tpu.memory_space<vmem>>, vector<32x8xbf16>
    %cst_14 = arith.constant dense<0.000000e+00> : vector<8x8xf32>
    %18 = tpu.matmul %16, %17, %cst_14 {dimension_numbers = #tpu.dot_dimension_numbers<[1], [0], [0], [1], [0, 0, 1, 1], [], []>} : vector<8x32xbf16>, vector<32x8xbf16>, vector<8x8xf32> -> vector<8x8xf32>
    %c0_15 = arith.constant 0 : index
    %c0_16 = arith.constant 0 : index
    %19 = vector.load %arg7[%c0_15, %c0_16] : memref<1x8xf32, #tpu.memory_space<vmem>>, vector<1x8xf32>
    %20 = vector.broadcast %19 : vector<1x8xf32> to vector<8x8xf32>
    %21 = arith.addf %18, %20 : vector<8x8xf32>
    %c0_17 = arith.constant 0 : index
    %c0_18 = arith.constant 0 : index
    %22 = vector.load %arg8[%c0_17, %c0_18] : memref<8x8xf32, #tpu.memory_space<vmem>>, vector<8x8xf32>
    tpu.vector_store %arg8[%c0_17, %c0_18], %21 {strides = array<i32>} : memref<8x8xf32, #tpu.memory_space<vmem>>, vector<8x8xf32>,
    return
  }
  func.func @transform_0(%arg0: i32) -> (i32, i32) {
    %c0_i32 = arith.constant 0 : i32
    %c0_i32_0 = arith.constant 0 : i32
    return %arg0, %c0_i32 : i32, i32
  }
  func.func @transform_1(%arg0: i32) -> (i32, i32) {
    %c0_i32 = arith.constant 0 : i32
    %c0_i32_0 = arith.constant 0 : i32
    %c0_i32_1 = arith.constant 0 : i32
    return %c0_i32, %c0_i32_0 : i32, i32
  }
  func.func @transform_2(%arg0: i32) -> (i32, i32) {
    %c0_i32 = arith.constant 0 : i32
    %c0_i32_0 = arith.constant 0 : i32
    %c0_i32_1 = arith.constant 0 : i32
    return %c0_i32, %c0_i32_0 : i32, i32
  }
  func.func @transform_3(%arg0: i32) -> (i32, i32) {
    %c0_i32 = arith.constant 0 : i32
    %c0_i32_0 = arith.constant 0 : i32
    %c0_i32_1 = arith.constant 0 : i32
    return %c0_i32, %c0_i32_0 : i32, i32
  }
  func.func @transform_4(%arg0: i32) -> (i32, i32) {
    %c0_i32 = arith.constant 0 : i32
    %c0_i32_0 = arith.constant 0 : i32
    %c0_i32_1 = arith.constant 0 : i32
    return %c0_i32, %c0_i32_0 : i32, i32
  }
  func.func @transform_5(%arg0: i32) -> (i32, i32) {
    %c0_i32 = arith.constant 0 : i32
    %c0_i32_0 = arith.constant 0 : i32
    %c0_i32_1 = arith.constant 0 : i32
    return %c0_i32, %c0_i32_0 : i32, i32
  }
  func.func @transform_6(%arg0: i32) -> (i32, i32) {
    %c0_i32 = arith.constant 0 : i32
    %c0_i32_0 = arith.constant 0 : i32
    %c0_i32_1 = arith.constant 0 : i32
    return %c0_i32, %c0_i32_0 : i32, i32
  }
  func.func @transform_7(%arg0: i32) -> (i32, i32) {
    %c0_i32 = arith.constant 0 : i32
    %c0_i32_0 = arith.constant 0 : i32
    return %arg0, %c0_i32 : i32, i32
  }
}

</mosaic_0001>

<bundles_post_ra>
// kernel: tpu_custom_call.1
= control target key start
LH: loop header
LB: loop body
LE: loop exit
PB: predicated region body
PF: predicated region fallthrough
CT: control target
= control target key end

     0   :  { %s570_s0 = inlined_call_operand.vmem [shape: bf16[8,256], index: 0, kind: input, shape index: {}]   ;;  %s571_s1 = inlined_call_operand.vmem [shape: bf16[256,64], index: 1, kind: input, shape index: {}]   ;;  %s572_s2 = inlined_call_operand.vmem [shape: f32[1,64], index: 2, kind: input, shape index: {}]   ;;  %s573_s3 = inlined_call_operand.vmem [shape: bf16[64,32], index: 3, kind: input, shape index: {}]   ;;  %s574_s4 = inlined_call_operand.vmem [shape: f32[1,32], index: 4, kind: input, shape index: {}]   ;;  %s575_s5 = inlined_call_operand.vmem [shape: bf16[32,8], index: 5, kind: input, shape index: {}]   ;;  %s576_s6 = inlined_call_operand.vmem [shape: f32[1,8], index: 6, kind: input, shape index: {}]   ;;  %s577_s7 = inlined_call_operand.hbm [shape: f32[8,8], index: 7, kind: output, shape index: {}]  }
   0x1   :  { %v403_v0 = vld [vmem:[%s571_s1 + $0x38] sm:$0xff]  ;;  %v402_v2 = vld [vmem:[%s571_s1 + $0x30] sm:$0xff]  ;;  %v401_v4 = vld [vmem:[%s571_s1 + $0x28] sm:$0xff] }
   0x2   :  { %v411_v1 = vld [vmem:[%s571_s1 + $0x78] sm:$0xff]  ;;  %168 = vmatpush.bf16.msra.mxu0 %v403_v0  ;;  %v410_v3 = vld [vmem:[%s571_s1 + $0x70] sm:$0xff]  ;;  %v409_v6 = vld [vmem:[%s571_s1 + $0x68] sm:$0xff] }
   0x3   :  { %181 = vmatpush.bf16.msra.mxu1 %v411_v1  ;;  %v415_v5 = vld [vmem:[%s573_s3 + $0x18] sm:$0xff]  ;;  %v414_v7 = vld [vmem:[%s573_s3 + $0x10] sm:$0xff] }
   0x4   :  { %240 = vmatpush.bf16.msra.mxu2 %v415_v5 }
   0x6   :  { %169 = vmatpush.bf16.msra.mxu0 %v402_v2 }
   0x7   :  { %182 = vmatpush.bf16.msra.mxu1 %v410_v3 }
   0x8   :  { %12 = vsyncpa [#allocation3], 0  ;;  %v400_v8 = vld [vmem:[%s571_s1 + $0x20] sm:$0xff]  ;;  %241 = vmatpush.bf16.msra.mxu2 %v414_v7  ;;  %v399_v10 = vld [vmem:[%s571_s1 + $0x18] sm:$0xff]  ;;  %vm232_vm0 = vcmask 523264   ;;  %vm271_vm1 = vcmask 261120  }
   0x9   :  { %v408_v9 = vld [vmem:[%s571_s1 + $0x60] sm:$0xff]  ;;  %v407_v11 = vld [vmem:[%s571_s1 + $0x58] sm:$0xff]  ;;  %v398_v12 = vld [vmem:[%s571_s1 + $0x10] sm:$0xff]  ;;  %s448_s26 = smov [#allocation2]   ;;  %s297_s29 = sshll.u32 %s577_s7, 4  ;;  %vm288_vm2 = vcmask 64512   ;;  %s298_s29 = int_to_ptr.hbm [resolvable:$true] %s297_s29 }
   0xa   :  { %170 = vmatpush.bf16.msra.mxu0 %v401_v4  ;;  %v406_v13 = vld [vmem:[%s571_s1 + $0x50] sm:$0xff]  ;;  %v397_v14 = vld [vmem:[%s571_s1 + $0x8] sm:$0xff]  ;;  %v28_v16 = vld [vmem:[%s570_s0] sm:$0xff]  ;;  %s295_s27 = sshll.u32 %s448_s26, 4  ;;  %s296_s27 = int_to_ptr.vmem [resolvable:$true] %s295_s27 }
   0xb   :  { %183 = vmatpush.bf16.msra.mxu1 %v409_v6  ;;  %v405_v15 = vld [vmem:[%s571_s1 + $0x48] sm:$0xff]  ;;  %v66_v17 = vunpack.c.l.b16 %v28_v16  ;;  %v67_v18 = vunpack.c.h.b16 %v28_v16  ;;  %v396_v19 = vld [vmem:[%s571_s1] sm:$0xff] }
   0xc   :  { %v404_v20 = vld [vmem:[%s571_s1 + $0x40] sm:$0xff]  ;;  %v413_v23 = vld [vmem:[%s573_s3 + $0x8] sm:$0xff] }
   0xd   :  { %v68_v21 = vpack.c.b16 %v66_v17, %v66_v17  ;;  %v69_v22 = vpack.c.b16 %v67_v18, %v67_v18  ;;  %242 = vmatpush.bf16.msra.mxu2 %v413_v23  ;;  %v412_v24 = vld [vmem:[%s573_s3] sm:$0xff]  ;;  %v417_v34 = vld [vmem:[%s575_s5 + $0x8] sm:$0xff] }
   0xe   :  { %171 = vmatpush.bf16.msra.mxu0 %v400_v8  ;;  %v419_v25 = vld [vmem:[%s572_s2] ss:$0 sm:$0xff]  ;;  %281 = vmatpush.bf16.msra.mxu3 %v417_v34 }
   0xf   :  { %184 = vmatpush.bf16.msra.mxu1 %v408_v9  ;;  %v416_v35 = vld [vmem:[%s575_s5] sm:$0xff] }
  0x10   :  { %v420_v36 = vld [vmem:[%s574_s4] ss:$0 sm:$0xff] }
  0x11   :  { %243 = vmatpush.bf16.msra.mxu2 %v412_v24  ;;  %v421_v42 = vld [vmem:[%s576_s6] ss:$0 sm:$0xff] }
  0x12   :  { %172 = vmatpush.bf16.msra.mxu0 %v399_v10  ;;  %282 = vmatpush.bf16.msra.mxu3 %v416_v35 }
  0x13   :  { %185 = vmatpush.bf16.msra.mxu1 %v407_v11 }
  0x16   :  { %173 = vmatpush.bf16.msra.mxu0 %v398_v12 }
  0x17   :  { %186 = vmatpush.bf16.msra.mxu1 %v406_v13 }
  0x1a   :  { %174 = vmatpush.bf16.msra.mxu0 %v397_v14 }
  0x1b   :  { %187 = vmatpush.bf16.msra.mxu1 %v405_v15 }
  0x1e   :  { %175 = vmatpush.bf16.msra.mxu0 %v396_v19 }
  0x1f   :  { %188 = vmatpush.bf16.msra.mxu1 %v404_v20 }
  0x21   :  { %176 = vmatmul.bf16.vlgmr.msra.gmra.mxu0 %v68_v21 }
  0x22   :  { %189 = vmatmul.bf16.vlgmr.msra.gmra.mxu1 %v69_v22 }
  0x9e   :  { %v177_v26 = vpop.f32.mrf.mxu0 }
  0x9f   :  { %v190_v27 = vpop.f32.mrf.mxu1  ;;  %v178_v28 = vadd.f32 %v419_v25, %v177_v26 }
  0xa1   :  { %v191_v29 = vadd.f32 %v190_v27, %v178_v28 }
  0xa3   :  { %v194_v30 = vmax.f32 %v191_v29, 0.0 }
  0xa5   :  { %v195_v31 = vpack.c.bf16 %v194_v30, %v194_v30 }
  0xa6   :  { %v179_v32 = vpop.f32.mrf.mxu0 }
  0xa7   :  { %v192_v33 = vpop.f32.mrf.mxu1  ;;  %386 = vmatmul.msk.bf16.vlgmr.msra.gmra.mxu2 %vm232_vm0, %v195_v31 }
 0x12a   :  { %v245_v37 = vpop.f32.mrf.mxu2 }
 0x12b   :  { %v246_v38 = vadd.f32 %v420_v36, %v245_v37 }
 0x12d   :  { %v249_v39 = vmax.f32 %v246_v38, 0.0 }
 0x12f   :  { %v250_v40 = vpack.c.bf16 %v249_v39, %v249_v39 }
 0x131   :  { %395 = vmatmul.msk.bf16.vlgmr.msra.gmra.mxu3 %vm271_vm1, %v250_v40 }
 0x132   :  { %v247_v41 = vpop.f32.mrf.mxu2 }
 0x1b4   :  { %v284_v43 = vpop.f32.mrf.mxu3 }
 0x1b5   :  { %v285_v44 = vadd.f32 %v421_v42, %v284_v43 }
 0x1b7   :  { %289 = vst.msk [vmem:[#allocation2] sm:$0xff] %vm288_vm2, %v285_v44 }
 0x1b8   :  { %300 = dma.vmem_to_hbm [thread:$0]  %s296_s27, 128, %s298_s29, [#allocation3]  }
 0x1bc   :  { %v286_v45 = vpop.f32.mrf.mxu3 }
 0x1bd   :  { %446 = dma.done.wait [#allocation3], 128  }
 0x1be   :  { %447 = vsyncadd [#allocation3], 4294967168 }
 0x1bf   :  { %305 = vsyncpa [#allocation3], 1 }

</bundles_post_ra>
